<compile_context>
chip_gen: v5e
topology: v5e:2x2
jax: 0.10.0
libtpu: 0.0.40
codegen_flags: <defaults>
</compile_context>

<pallas_src>
import jax
import jax.numpy as jnp
from jax.experimental import pallas as pl
from jax.experimental.pallas import tpu as pltpu

EPS = 1e-07
SZ = 3  # 2 * tsz_h + 1 with tsz_h = 1 (module default)


def _vmem_estimate(tb, HW, n_big_ops, elem_bytes, compute_bytes):
    """DMA double-buffers for the big operands + live in-kernel temporaries."""
    dma = n_big_ops * 2 * tb * HW * elem_bytes
    temps = (10 * compute_bytes + 4) * tb * HW      # ~10 live temps + one f32 cast
    return dma + temps


def _pick_tb(B, HW, elem_bytes, compute_bytes, n_big_ops,
             target_bytes=2 << 20, vmem_cap=40 << 20):
    """Slabs per grid block.  Prefers (a) an exact divisor of B (no HBM pad
    round-trip), (b) >= 2 blocks (both v7x TensorCores get work), (c) ~2 MiB
    blocks per operand, while keeping the VMEM estimate under `vmem_cap`."""
    raw = max(1, target_bytes // max(1, HW * elem_bytes))
    while raw > 8 and _vmem_estimate(raw, HW, n_big_ops, elem_bytes,
                                     compute_bytes) > vmem_cap:
        raw //= 2
    raw = min(raw, B)

    # Exact divisors of B satisfying the sublane (%8) tiling rule -> no padding.
    cands = [d for d in range(1, raw + 1)
             if B % d == 0 and (d % 8 == 0 or d == B)]
    if cands:
        multi = [d for d in cands if d < B]          # >= 2 blocks when possible
        return max(multi) if multi else max(cands)
    if (_vmem_estimate(B, HW, n_big_ops, elem_bytes, compute_bytes) <= vmem_cap
            and B * HW * elem_bytes <= 4 * target_bytes):
        return B                                     # single slightly-big block
    return max(8, (raw // 8) * 8)                    # rare fallback: pad B up


def _make_kernel(W, HW, has_mask, valid_slabs, compute_dtype):
    """valid_slabs is None when B divides evenly into blocks (no padded slabs)."""
    aligned = (HW % 128 == 0)            # lane-aligned rows -> XLU roll shifts
    pot_w = (W & (W - 1)) == 0           # power-of-two W -> bit-mask column index

    def body(fg_ref, ct_ref, m_ref, out_ref):
        tb = fg_ref.shape[0]
        cdt = compute_dtype
        zero = jnp.zeros((), cdt)

        # Per-lane position inside a flattened (H*W,) slab row.
        col = jax.lax.broadcasted_iota(jnp.int32, (1, HW), 1)
        wcol = (col & (W - 1)) if pot_w else (col % W)
        at_w_first = wcol == 0           # w == 0     (no w-1 neighbour)
        at_w_last = wcol == W - 1        # w == W-1   (no w+1 neighbour)
        at_h_first = col < W             # h == 0     (no h-1 neighbour)
        at_h_last = col >= HW - W        # h == H-1   (no h+1 neighbour)

        def shift(x, d, border):
            """result[:, f] = x[:, f - d] within a slab row; 0 where `border`."""
            if aligned:
                r = pltpu.roll(x, d % HW, 1)         # XLU lane rotate (near-free)
            else:
                pad = jnp.zeros((x.shape[0], abs(d)), x.dtype)
                r = (jnp.concatenate([pad, x[:, :HW - d]], axis=1) if d > 0
                     else jnp.concatenate([x[:, -d:], pad], axis=1))
            return jnp.where(border, zero, r)

        # sigmoid via a single EUP tanh; the whole chain stays in `cdt`
        # (bf16 when the inputs are bf16 -> halves VALU/EUP work & temps).
        fg = 0.5 * jnp.tanh(0.5 * fg_ref[...].astype(cdt)) + 0.5
        ct = 0.5 * jnp.tanh(0.5 * ct_ref[...].astype(cdt)) + 0.5

        # sobel_x = [1,0,-1] along W (pad 1); sobel_y = [1,0,-1] along H (pad 1)
        edge_x = shift(fg, 1, at_w_first) - shift(fg, -1, at_w_last)
        edge_y = shift(fg, W, at_h_first) - shift(fg, -W, at_h_last)
        edge = jnp.sqrt(edge_x * edge_x + edge_y * edge_y + EPS)
        edge = jnp.clip(edge, EPS, 1.0 - EPS)

        # Separable 3x3 max-pool with zero padding (zero never wins: edge >= EPS).
        pw = jnp.maximum(edge, jnp.maximum(shift(edge, 1, at_w_first),
                                           shift(edge, -1, at_w_last)))
        pooled = jnp.maximum(pw, jnp.maximum(shift(pw, W, at_h_first),
                                             shift(pw, -W, at_h_last)))

        diff = pooled - ct
        loss = diff * diff
        if has_mask:
            loss = loss * m_ref[...].astype(cdt)     # (tb,HW) or broadcast (1,HW)

        # Two-stage f32 reduction: lanes -> per-slab row sums -> block scalar.
        rows = jnp.sum(loss.astype(jnp.float32), axis=1, keepdims=True)
        if valid_slabs is not None:      # padded-tail fallback: mask whole slabs
            ridx = jax.lax.broadcasted_iota(jnp.int32, rows.shape, 0)
            rows = jnp.where(pl.program_id(0) * tb + ridx < valid_slabs, rows, 0.0)
        out_ref[...] = jnp.broadcast_to(jnp.sum(rows), out_ref.shape)

    if has_mask:
        def kernel(fg_ref, ct_ref, m_ref, out_ref):
            body(fg_ref, ct_ref, m_ref, out_ref)
    else:
        def kernel(fg_ref, ct_ref, out_ref):
            body(fg_ref, ct_ref, None, out_ref)
    return kernel


def fg_contour_consistency(pred1, pred2, mask=None, tsz_h=1, tb=None):
    """Pallas TPU equivalent of FgContourConsistency.forward.  Returns a scalar."""
    assert tsz_h == 1, "F.pad(1) + max_pool(sz) only shape-matches for tsz_h=1"
    assert pred1.shape == pred2.shape
    N, C, D, H, W = pred1.shape
    assert C == 1, "the module's 1-in-channel sobel conv requires C == 1"
    B, HW = N * C * D, H * W
    numel = B * HW

    elem_bytes = jnp.dtype(pred1.dtype).itemsize
    compute_dtype = jnp.bfloat16 if pred1.dtype == jnp.bfloat16 else jnp.float32
    compute_bytes = jnp.dtype(compute_dtype).itemsize

    # --- mask handling: avoid materializing broadcasts in HBM when possible.
    has_mask = mask is not None
    mask_is_spatial = False
    mask2d = None
    if has_mask:
        mshape = tuple(mask.shape)
        if mshape == tuple(pred1.shape):
            mask2d = mask.reshape(B, HW)
        elif mshape[-2:] == (H, W) and all(s == 1 for s in mshape[:-2]):
            mask_is_spatial = True                   # broadcast via the BlockSpec
            mask2d = mask.reshape(1, HW)
        else:
            # TODO(synk): express partial (per-N / per-D) mask broadcasts through
            # the mask BlockSpec index_map instead of materializing them in HBM.
            mask2d = jnp.broadcast_to(mask, pred1.shape).reshape(B, HW)
    n_big_ops = 2 + (1 if (has_mask and not mask_is_spatial) else 0)

    # --- block size (slabs per grid step).
    if tb is None:
        tb = _pick_tb(B, HW, elem_bytes, compute_bytes, n_big_ops)
    if tb >= B:
        tb = B                                       # single full block
    elif tb % 8 != 0:
        raise ValueError("tb must be a multiple of 8 (sublane tiling) or >= B")

    num_blocks = -(-B // tb)
    B_pad = num_blocks * tb

    fg = pred1.reshape(B, HW)        # free contiguous reshape; dtype preserved
    ct = pred2.reshape(B, HW)
    operands = [fg, ct]
    big_spec = pl.BlockSpec((tb, HW), lambda i: (i, 0))
    specs = [big_spec, big_spec]
    if has_mask:
        operands.append(mask2d)
        specs.append(pl.BlockSpec((1, HW), lambda i: (0, 0)) if mask_is_spatial
                     else big_spec)

    if B_pad != B:   # rare fallback; padded slabs are masked per-row in-kernel
        padcfg = ((0, B_pad - B), (0, 0))
        operands[0] = jnp.pad(operands[0], padcfg)
        operands[1] = jnp.pad(operands[1], padcfg)
        if has_mask and not mask_is_spatial:
            operands[2] = jnp.pad(operands[2], padcfg)

    kernel = _make_kernel(W=W, HW=HW, has_mask=has_mask,
                          valid_slabs=(B if B_pad != B else None),
                          compute_dtype=compute_dtype)

    est = _vmem_estimate(tb, HW, n_big_ops, elem_bytes, compute_bytes)
    vmem_limit = int(min(max(est + (2 << 20), 16 << 20), 48 << 20))

    in_bytes = sum(int(o.size) * jnp.dtype(o.dtype).itemsize for o in operands)
    cost = pl.CostEstimate(flops=30 * numel, transcendentals=3 * numel,
                           bytes_accessed=in_bytes + num_blocks * 128 * 4)

    partials = pl.pallas_call(
        kernel,
        out_shape=jax.ShapeDtypeStruct((num_blocks, 1, 128), jnp.float32),
        grid=(num_blocks,),
        in_specs=specs,
        out_specs=pl.BlockSpec((1, 1, 128), lambda i: (i, 0, 0)),
        compiler_params=pltpu.CompilerParams(
            dimension_semantics=("parallel",),       # megacore shardable
            vmem_limit_bytes=vmem_limit),
        cost_estimate=cost,
    )(*operands)

    return jnp.sum(partials[:, 0, 0]) / numel


def _reference(pred1, pred2, mask=None):
    """Pure-JAX reference of the PyTorch forward, for a sanity check."""
    fg = jax.nn.sigmoid(pred1.astype(jnp.float32))
    ct = jax.nn.sigmoid(pred2.astype(jnp.float32))
    fpw = jnp.pad(fg, ((0, 0), (0, 0), (0, 0), (0, 0), (1, 1)))
    edge_x = fpw[..., :-2] - fpw[..., 2:]
    fph = jnp.pad(fg, ((0, 0), (0, 0), (0, 0), (1, 1), (0, 0)))
    edge_y = fph[..., :-2, :] - fph[..., 2:, :]
    edge = jnp.sqrt(edge_x ** 2 + edge_y ** 2 + EPS)
    edge = jnp.clip(edge, EPS, 1.0 - EPS)
    ep = jnp.pad(edge, ((0, 0), (0, 0), (0, 0), (1, 1), (1, 1)))
    H, W = fg.shape[-2:]
    pooled = jnp.full(fg.shape, -jnp.inf, jnp.float32)
    for dh in range(SZ):
        for dw in range(SZ):
            pooled = jnp.maximum(pooled, ep[..., dh:dh + H, dw:dw + W])
    loss = (pooled - ct) ** 2
    if mask is not None:
        loss = loss * mask
    return jnp.mean(loss)


if __name__ == "__main__":
    key = jax.random.PRNGKey(0)
    keys = jax.random.split(key, 8)

    # Case 1: mask=None, lane-aligned slabs (H*W=256 -> roll path), auto block.
    N, C, D, H, W = 2, 1, 4, 16, 16          # conv weights force C == 1
    p1 = jax.random.normal(keys[0], (N, C, D, H, W), jnp.float32)
    p2 = jax.random.normal(keys[1], (N, C, D, H, W), jnp.float32)
    out1 = jax.block_until_ready(fg_contour_consistency(p1, p2))
    ref1 = _reference(p1, p2)
    assert jnp.allclose(out1, ref1, rtol=1e-4, atol=1e-6), (out1, ref1)

    # Case 2: full-shape weight mask + forced tb that does not divide B
    # (exercises the padded-tail / per-row validity path), B=12, tb=8 -> 2 blocks.
    q1 = jax.random.normal(keys[2], (2, 1, 6, H, W), jnp.float32)
    q2 = jax.random.normal(keys[3], (2, 1, 6, H, W), jnp.float32)
    m = (jax.random.uniform(keys[4], (2, 1, 6, H, W)) > 0.3).astype(jnp.float32)
    out2 = jax.block_until_ready(fg_contour_consistency(q1, q2, mask=m, tb=8))
    ref2 = _reference(q1, q2, m)
    assert jnp.allclose(out2, ref2, rtol=1e-4, atol=1e-6), (out2, ref2)

    # Case 3: spatial-only mask (1,1,1,H,W) -> broadcast through the BlockSpec
    # (no full-size HBM mask operand).
    ms = (jax.random.uniform(keys[5], (1, 1, 1, H, W)) > 0.5).astype(jnp.float32)
    out3 = jax.block_until_ready(fg_contour_consistency(p1, p2, mask=ms))
    ref3 = _reference(p1, p2, ms)
    assert jnp.allclose(out3, ref3, rtol=1e-4, atol=1e-6), (out3, ref3)

    # Case 4: H*W not a multiple of 128 -> concat-shift fallback path.
    r1 = jax.random.normal(keys[6], (1, 1, 5, 8, 8), jnp.float32)
    r2 = jax.random.normal(keys[7], (1, 1, 5, 8, 8), jnp.float32)
    out4 = jax.block_until_ready(fg_contour_consistency(r1, r2))
    ref4 = _reference(r1, r2)
    assert jnp.allclose(out4, ref4, rtol=1e-4, atol=1e-6), (out4, ref4)

    # Case 5: bf16 inputs -> bf16 compute chain, f32 accumulation.
    out5 = jax.block_until_ready(
        fg_contour_consistency(p1.astype(jnp.bfloat16), p2.astype(jnp.bfloat16)))
    ref5 = _reference(p1.astype(jnp.bfloat16), p2.astype(jnp.bfloat16))
    assert jnp.allclose(out5, ref5, rtol=5e-2, atol=5e-3), (out5, ref5)

    print("KERNEL_OK")
</pallas_src>

<mosaic_0001>
module attributes {stable_mosaic.version = 11 : i64} {
  func.func @kernel(%arg0: i32, %arg1: memref<8x256xf32, #tpu.memory_space<vmem>>, %arg2: memref<8x256xf32, #tpu.memory_space<vmem>>, %arg3: memref<1x1x128xf32, #tpu.memory_space<vmem>>) attributes {dimension_semantics = [#tpu.dimension_semantics<parallel>], iteration_bounds = array<i64: 1>, scalar_prefetch = 0 : i64, scratch_operands = 0 : i64, tpu.core_type = #tpu.core_type<tc>, window_params = [{transform_indices = @transform_0, window_bounds = array<i64: 8, 256>}, {transform_indices = @transform_1, window_bounds = array<i64: 8, 256>}, {transform_indices = @transform_2, window_bounds = array<i64: 1, 1, 128>}]} {
    %0 = tpu.iota {dimensions = array<i32: 1>} : vector<1x256xi32>
    %c15_i32 = arith.constant 15 : i32
    %1 = vector.broadcast %c15_i32 : i32 to vector<1x256xi32>
    %2 = arith.andi %0, %1 : vector<1x256xi32>
    %c0_i32 = arith.constant 0 : i32
    %3 = vector.broadcast %c0_i32 : i32 to vector<1x256xi32>
    %4 = arith.cmpi eq, %2, %3 : vector<1x256xi32>
    %c15_i32_0 = arith.constant 15 : i32
    %5 = vector.broadcast %c15_i32_0 : i32 to vector<1x256xi32>
    %6 = arith.cmpi eq, %2, %5 : vector<1x256xi32>
    %c16_i32 = arith.constant 16 : i32
    %7 = vector.broadcast %c16_i32 : i32 to vector<1x256xi32>
    %8 = arith.cmpi slt, %0, %7 : vector<1x256xi32>
    %c240_i32 = arith.constant 240 : i32
    %9 = vector.broadcast %c240_i32 : i32 to vector<1x256xi32>
    %10 = arith.cmpi sge, %0, %9 : vector<1x256xi32>
    %c0 = arith.constant 0 : index
    %c0_1 = arith.constant 0 : index
    %11 = vector.load %arg1[%c0, %c0_1] : memref<8x256xf32, #tpu.memory_space<vmem>>, vector<8x256xf32>
    %cst = arith.constant 5.000000e-01 : f32
    %12 = vector.broadcast %cst : f32 to vector<8x256xf32>
    %13 = arith.mulf %12, %11 : vector<8x256xf32>
    %14 = math.tanh %13 : vector<8x256xf32>
    %cst_2 = arith.constant 5.000000e-01 : f32
    %15 = vector.broadcast %cst_2 : f32 to vector<8x256xf32>
    %16 = arith.mulf %15, %14 : vector<8x256xf32>
    %cst_3 = arith.constant 5.000000e-01 : f32
    %17 = vector.broadcast %cst_3 : f32 to vector<8x256xf32>
    %18 = arith.addf %16, %17 : vector<8x256xf32>
    %c0_4 = arith.constant 0 : index
    %c0_5 = arith.constant 0 : index
    %19 = vector.load %arg2[%c0_4, %c0_5] : memref<8x256xf32, #tpu.memory_space<vmem>>, vector<8x256xf32>
    %cst_6 = arith.constant 5.000000e-01 : f32
    %20 = vector.broadcast %cst_6 : f32 to vector<8x256xf32>
    %21 = arith.mulf %20, %19 : vector<8x256xf32>
    %22 = math.tanh %21 : vector<8x256xf32>
    %cst_7 = arith.constant 5.000000e-01 : f32
    %23 = vector.broadcast %cst_7 : f32 to vector<8x256xf32>
    %24 = arith.mulf %23, %22 : vector<8x256xf32>
    %cst_8 = arith.constant 5.000000e-01 : f32
    %25 = vector.broadcast %cst_8 : f32 to vector<8x256xf32>
    %26 = arith.addf %24, %25 : vector<8x256xf32>
    %c1_i32 = arith.constant 1 : i32
    %27 = tpu.dynamic_rotate %18 by %c1_i32 dim 1 : vector<8x256xf32>, i32 -> vector<8x256xf32>
    %cst_9 = arith.constant 0.000000e+00 : f32
    %28 = vector.shape_cast %4 : vector<1x256xi1> to vector<1x256xi1>
    %29 = vector.broadcast %28 : vector<1x256xi1> to vector<8x256xi1>
    %30 = vector.broadcast %cst_9 : f32 to vector<8x256xf32>
    %31 = arith.select %29, %30, %27 : vector<8x256xi1>, vector<8x256xf32>
    %c255_i32 = arith.constant 255 : i32
    %32 = tpu.dynamic_rotate %18 by %c255_i32 dim 1 : vector<8x256xf32>, i32 -> vector<8x256xf32>
    %cst_10 = arith.constant 0.000000e+00 : f32
    %33 = vector.shape_cast %6 : vector<1x256xi1> to vector<1x256xi1>
    %34 = vector.broadcast %33 : vector<1x256xi1> to vector<8x256xi1>
    %35 = vector.broadcast %cst_10 : f32 to vector<8x256xf32>
    %36 = arith.select %34, %35, %32 : vector<8x256xi1>, vector<8x256xf32>
    %37 = arith.subf %31, %36 : vector<8x256xf32>
    %c16_i32_11 = arith.constant 16 : i32
    %38 = tpu.dynamic_rotate %18 by %c16_i32_11 dim 1 : vector<8x256xf32>, i32 -> vector<8x256xf32>
    %cst_12 = arith.constant 0.000000e+00 : f32
    %39 = vector.shape_cast %8 : vector<1x256xi1> to vector<1x256xi1>
    %40 = vector.broadcast %39 : vector<1x256xi1> to vector<8x256xi1>
    %41 = vector.broadcast %cst_12 : f32 to vector<8x256xf32>
    %42 = arith.select %40, %41, %38 : vector<8x256xi1>, vector<8x256xf32>
    %c240_i32_13 = arith.constant 240 : i32
    %43 = tpu.dynamic_rotate %18 by %c240_i32_13 dim 1 : vector<8x256xf32>, i32 -> vector<8x256xf32>
    %cst_14 = arith.constant 0.000000e+00 : f32
    %44 = vector.shape_cast %10 : vector<1x256xi1> to vector<1x256xi1>
    %45 = vector.broadcast %44 : vector<1x256xi1> to vector<8x256xi1>
    %46 = vector.broadcast %cst_14 : f32 to vector<8x256xf32>
    %47 = arith.select %45, %46, %43 : vector<8x256xi1>, vector<8x256xf32>
    %48 = arith.subf %42, %47 : vector<8x256xf32>
    %49 = arith.mulf %37, %37 : vector<8x256xf32>
    %50 = arith.mulf %48, %48 : vector<8x256xf32>
    %51 = arith.addf %49, %50 : vector<8x256xf32>
    %cst_15 = arith.constant 1.000000e-07 : f32
    %52 = vector.broadcast %cst_15 : f32 to vector<8x256xf32>
    %53 = arith.addf %51, %52 : vector<8x256xf32>
    %54 = math.sqrt %53 : vector<8x256xf32>
    %cst_16 = arith.constant 1.000000e-07 : f32
    %cst_17 = arith.constant 0.99999988 : f32
    %55 = vector.broadcast %cst_16 : f32 to vector<8x256xf32>
    %56 = arith.maximumf %55, %54 : vector<8x256xf32>
    %57 = vector.broadcast %cst_17 : f32 to vector<8x256xf32>
    %58 = arith.minimumf %57, %56 : vector<8x256xf32>
    %c1_i32_18 = arith.constant 1 : i32
    %59 = tpu.dynamic_rotate %58 by %c1_i32_18 dim 1 : vector<8x256xf32>, i32 -> vector<8x256xf32>
    %cst_19 = arith.constant 0.000000e+00 : f32
    %60 = vector.shape_cast %4 : vector<1x256xi1> to vector<1x256xi1>
    %61 = vector.broadcast %60 : vector<1x256xi1> to vector<8x256xi1>
    %62 = vector.broadcast %cst_19 : f32 to vector<8x256xf32>
    %63 = arith.select %61, %62, %59 : vector<8x256xi1>, vector<8x256xf32>
    %c255_i32_20 = arith.constant 255 : i32
    %64 = tpu.dynamic_rotate %58 by %c255_i32_20 dim 1 : vector<8x256xf32>, i32 -> vector<8x256xf32>
    %cst_21 = arith.constant 0.000000e+00 : f32
    %65 = vector.shape_cast %6 : vector<1x256xi1> to vector<1x256xi1>
    %66 = vector.broadcast %65 : vector<1x256xi1> to vector<8x256xi1>
    %67 = vector.broadcast %cst_21 : f32 to vector<8x256xf32>
    %68 = arith.select %66, %67, %64 : vector<8x256xi1>, vector<8x256xf32>
    %69 = arith.maximumf %63, %68 : vector<8x256xf32>
    %70 = arith.maximumf %58, %69 : vector<8x256xf32>
    %c16_i32_22 = arith.constant 16 : i32
    %71 = tpu.dynamic_rotate %70 by %c16_i32_22 dim 1 : vector<8x256xf32>, i32 -> vector<8x256xf32>
    %cst_23 = arith.constant 0.000000e+00 : f32
    %72 = vector.shape_cast %8 : vector<1x256xi1> to vector<1x256xi1>
    %73 = vector.broadcast %72 : vector<1x256xi1> to vector<8x256xi1>
    %74 = vector.broadcast %cst_23 : f32 to vector<8x256xf32>
    %75 = arith.select %73, %74, %71 : vector<8x256xi1>, vector<8x256xf32>
    %c240_i32_24 = arith.constant 240 : i32
    %76 = tpu.dynamic_rotate %70 by %c240_i32_24 dim 1 : vector<8x256xf32>, i32 -> vector<8x256xf32>
    %cst_25 = arith.constant 0.000000e+00 : f32
    %77 = vector.shape_cast %10 : vector<1x256xi1> to vector<1x256xi1>
    %78 = vector.broadcast %77 : vector<1x256xi1> to vector<8x256xi1>
    %79 = vector.broadcast %cst_25 : f32 to vector<8x256xf32>
    %80 = arith.select %78, %79, %76 : vector<8x256xi1>, vector<8x256xf32>
    %81 = arith.maximumf %75, %80 : vector<8x256xf32>
    %82 = arith.maximumf %70, %81 : vector<8x256xf32>
    %83 = arith.subf %82, %26 : vector<8x256xf32>
    %84 = arith.mulf %83, %83 : vector<8x256xf32>
    %cst_26 = arith.constant dense<0.000000e+00> : vector<8xf32>
    %85 = vector.multi_reduction <add>, %84, %cst_26 [1] : vector<8x256xf32> to vector<8xf32>
    %86 = vector.shape_cast %85 : vector<8xf32> to vector<8x1xf32>
    %87 = vector.shape_cast %86 : vector<8x1xf32> to vector<1x8x1xf32>
    %cst_27 = arith.constant dense<0.000000e+00> : vector<1xf32>
    %88 = vector.multi_reduction <add>, %87, %cst_27 [1, 2] : vector<1x8x1xf32> to vector<1xf32>
    %89 = vector.shape_cast %88 : vector<1xf32> to vector<1x1x1xf32>
    %90 = vector.extract %89[0, 0, 0] : f32 from vector<1x1x1xf32>
    %91 = vector.broadcast %90 : f32 to vector<1x1x128xf32>
    %c0_28 = arith.constant 0 : index
    %c0_29 = arith.constant 0 : index
    %c0_30 = arith.constant 0 : index
    %92 = vector.load %arg3[%c0_28, %c0_29, %c0_30] : memref<1x1x128xf32, #tpu.memory_space<vmem>>, vector<1x1x128xf32>
    tpu.vector_store %arg3[%c0_28, %c0_29, %c0_30], %91 {strides = array<i32>} : memref<1x1x128xf32, #tpu.memory_space<vmem>>, vector<1x1x128xf32>,
    return
  }
  func.func @transform_0(%arg0: i32) -> (i32, i32) {
    %c0_i32 = arith.constant 0 : i32
    %c0_i32_0 = arith.constant 0 : i32
    return %arg0, %c0_i32 : i32, i32
  }
  func.func @transform_1(%arg0: i32) -> (i32, i32) {
    %c0_i32 = arith.constant 0 : i32
    %c0_i32_0 = arith.constant 0 : i32
    return %arg0, %c0_i32 : i32, i32
  }
  func.func @transform_2(%arg0: i32) -> (i32, i32, i32) {
    %c0_i32 = arith.constant 0 : i32
    %c0_i32_0 = arith.constant 0 : i32
    %c0_i32_1 = arith.constant 0 : i32
    return %arg0, %c0_i32, %c0_i32_0 : i32, i32, i32
  }
}

</mosaic_0001>

<bundles_post_ra>
// kernel: tpu_custom_call.1
= control target key start
LH: loop header
LB: loop body
LE: loop exit
PB: predicated region body
PF: predicated region fallthrough
CT: control target
= control target key end

     0   :  { %7 = vsyncpa [#allocation3], 0  ;;  %s472_s0 = inlined_call_operand.hbm [shape: f32[8,256], index: 0, kind: input, shape index: {}]   ;;  %s473_s1 = inlined_call_operand.hbm [shape: f32[8,256], index: 1, kind: input, shape index: {}]   ;;  %s474_s2 = inlined_call_operand.hbm [shape: f32[1,1,128], index: 2, kind: output, shape index: {}]  }
   0x1   :  { %8 = vsyncpa [#allocation6], 0 }
   0x2   :  { %9 = vsyncpa [#allocation4], 0  ;;  %s15_s11 = sshll.u32 %s472_s0, 4  ;;  %s341_s12 = smov [#allocation2]   ;;  %s16_s11 = int_to_ptr.hbm [resolvable:$true] %s15_s11 }
   0x3   :  { %s17_s13 = sshll.u32 %s341_s12, 4  ;;  %s26_s16 = sshll.u32 %s473_s1, 4  ;;  %s18_s13 = int_to_ptr.vmem [resolvable:$true] %s17_s13  ;;  %s27_s16 = int_to_ptr.hbm [resolvable:$true] %s26_s16 }
   0x4   :  { %20 = dma.hbm_to_vmem [thread:$0]  %s16_s11, 256, %s18_s13, [#allocation3]  }
   0x5   :  { %s342_s17 = smov [#allocation5]  }
   0x6   :  { %s28_s18 = sshll.u32 %s342_s17, 4  ;;  %s29_s18 = int_to_ptr.vmem [resolvable:$true] %s28_s18 }
   0x7   :  { %31 = dma.hbm_to_vmem [thread:$0]  %s27_s16, 256, %s29_s18, [#allocation6]  }
   0x8   :  { %335 = dma.done.wait [#allocation3], 256  }
   0x9   :  { %336 = vsyncadd [#allocation3], 4294967040 }
   0xa   :  { %337 = dma.done.wait [#allocation6], 256  }
   0xb   :  { %338 = vsyncadd [#allocation6], 4294967040  ;;  %v53_v0 = vld [vmem:[#allocation2] sm:$0xff]  ;;  %v54_v1 = vld [vmem:[#allocation2 + $0x8] sm:$0xff]  ;;  %s343_s0 = smov 127   ;;  %s344_s1 = smov 1   ;;  %v40_v10 = vlaneseq }
   0xc   :  { %v55_v2 = vmul.f32 0.5, %v53_v0  ;;  %v56_v3 = vmul.f32 0.5, %v54_v1  ;;  %s345_s19 = smov 16   ;;  %s346_s20 = smov 112   ;;  %v63_v25 = vld [vmem:[#allocation5] sm:$0xff]  ;;  %vm211_vm13 = vcmask 7168  }
   0xd   :  { %v377_v11 = vand.u32 127, %v40_v10  ;;  %s347_s21 = smov [#allocation7]   ;;  %s231_s25 = sshll.u32 %s474_s2, 4  ;;  %s232_s25 = int_to_ptr.hbm [resolvable:$true] %s231_s25 }
   0xe   :  { %251 = vtanh.f32 %v55_v2  ;;  %s229_s22 = sshll.u32 %s347_s21, 4  ;;  %s230_s22 = int_to_ptr.vmem [resolvable:$true] %s229_s22 }
   0xf   :  { %253 = vtanh.f32 %v56_v3  ;;  %v380_v15 = vadd.s32 128, %v377_v11  ;;  %v43_v16 = vand.u32 15, %v377_v11  ;;  %vm90_vm0 = vcmp.lt.s32.totalorder %v377_v11, 127 }
  0x10   :  { %vm77_vm1 = vcmp.lt.s32.totalorder %v377_v11, 1  ;;  %vm49_vm2 = vcmp.lt.s32.totalorder %v377_v11, 16  ;;  %vm117_vm7 = vcmp.lt.s32.totalorder %v377_v11, 112 }
  0x11   :  { %v44_v17 = vand.u32 15, %v380_v15  ;;  %vm387_vm3 = vcmp.eq.s32.totalorder %v43_v16, 15  ;;  %vm393_vm4 = vcmp.eq.s32.totalorder %v43_v16, 0  ;;  %vm52_vm8 = vcmp.ge.s32.totalorder %v380_v15, 240 }
  0x13   :  { %vm399_vm5 = vcmp.eq.s32.totalorder %v44_v17, 15  ;;  %vm405_vm6 = vcmp.eq.s32.totalorder %v44_v17, 0 }
  0x14   :  { %v252_v4 = vpop.eup %251 }
  0x15   :  { %v59_v5 = vmul.f32 0.5, %v252_v4  ;;  %v254_v6 = vpop.eup %253 }
  0x16   :  { %v60_v8 = vmul.f32 0.5, %v254_v6 }
  0x17   :  { %v61_v7 = vadd.f32 0.5, %v59_v5 }
  0x18   :  { %v62_v9 = vadd.f32 0.5, %v60_v8 }
  0x19   :  { %86 = vrot.lane.b32.xlu1 %v61_v7, %s343_s0  ;;  %73 = vrot.lane.b32.xlu0 %v61_v7, %s344_s1 }
  0x1a   :  { %101 = vrot.lane.b32.xlu2 %v61_v7, %s345_s19 }
  0x21   :  { %88 = vrot.lane.b32.xlu1 %v62_v9, %s343_s0  ;;  %75 = vrot.lane.b32.xlu0 %v62_v9, %s344_s1 }
  0x22   :  { %103 = vrot.lane.b32.xlu2 %v62_v9, %s345_s19 }
  0x29   :  { %115 = vrot.lane.b32.xlu1 %v62_v9, %s346_s20  ;;  %113 = vrot.lane.b32.xlu0 %v61_v7, %s346_s20 }
  0x74   :  { %v102_v14 = vpop.permute.xlu2 %101 }
  0x7c   :  { %v104_v24 = vpop.permute.xlu2 %103 }
  0x7d   :  { %v106_v31 = vsel %vm49_vm2, %v104_v24, %v102_v14  ;;  %v105_v41 = vsel %vm49_vm2, %v102_v14, %v104_v24 }
  0x7e   :  { %v111_v37 = vsel %vm49_vm2, 0.0, %v106_v31 }
  0x8b   :  { %v87_v12 = vpop.permute.xlu1 %86  ;;  %v74_v13 = vpop.permute.xlu0 %73 }
  0x93   :  { %v89_v18 = vpop.permute.xlu1 %88  ;;  %v76_v19 = vpop.permute.xlu0 %75 }
  0x94   :  { %v91_v21 = vsel %vm90_vm0, %v87_v12, %v89_v18  ;;  %v79_v23 = vsel %vm77_vm1, %v76_v19, %v74_v13  ;;  %v92_v26 = vsel %vm90_vm0, %v89_v18, %v87_v12  ;;  %v78_v28 = vsel %vm77_vm1, %v74_v13, %v76_v19 }
  0x95   :  { %v97_v29 = vsel %vm387_vm3, 0.0, %v91_v21  ;;  %v84_v30 = vsel %vm393_vm4, 0.0, %v79_v23  ;;  %v98_v32 = vsel %vm399_vm5, 0.0, %v92_v26  ;;  %v85_v33 = vsel %vm405_vm6, 0.0, %v78_v28 }
  0x96   :  { %v99_v34 = vsub.f32 %v84_v30, %v97_v29  ;;  %v100_v38 = vsub.f32 %v85_v33, %v98_v32 }
  0x98   :  { %v128_v45 = vmul.f32 %v99_v34, %v99_v34  ;;  %v129_v47 = vmul.f32 %v100_v38, %v100_v38  ;;  %v64_v34 = vld [vmem:[#allocation5 + $0x8] sm:$0xff] }
  0x99   :  { %v66_v22 = vmul.f32 0.5, %v64_v34 }
  0x9b   :  { %v116_v35 = vpop.permute.xlu1 %115  ;;  %v114_v36 = vpop.permute.xlu0 %113 }
  0x9c   :  { %v118_v39 = vsel %vm117_vm7, %v114_v36, %v116_v35  ;;  %v119_v40 = vsel %vm117_vm7, %v116_v35, %v114_v36  ;;  %v65_v35 = vmul.f32 0.5, %v63_v25 }
  0x9d   :  { %v125_v42 = vsel %vm52_vm8, 0.0, %v119_v40  ;;  %v126_v43 = vsub.f32 %v111_v37, %v118_v39 }
  0x9e   :  { %v127_v44 = vsub.f32 %v105_v41, %v125_v42 }
  0x9f   :  { %v130_v46 = vmul.f32 %v126_v43, %v126_v43 }
  0xa0   :  { %v131_v48 = vmul.f32 %v127_v44, %v127_v44 }
  0xa1   :  { %v132_v49 = vadd.f32 %v130_v46, %v128_v45 }
  0xa2   :  { %v133_v50 = vadd.f32 %v131_v48, %v129_v47 }
  0xa3   :  { %v134_v51 = vadd.f32 1e-07, %v132_v49 }
  0xa4   :  { %v135_v52 = vadd.f32 1e-07, %v133_v50 }
  0xa5   :  { %255 = vrsqrt.f32 %v134_v51  ;;  %vm143_vm9 = vcmp.eq.f32.partialorder %v134_v51, inf  ;;  %v146_v2 = vand.u32 2147483648, %v134_v51  ;;  %vm145_vm10 = vcmp.eq.f32.partialorder %v134_v51, 0.0 }
  0xa6   :  { %257 = vrsqrt.f32 %v135_v52  ;;  %vm155_vm11 = vcmp.eq.f32.partialorder %v135_v52, inf  ;;  %v158_v5 = vand.u32 2147483648, %v135_v52  ;;  %vm157_vm12 = vcmp.eq.f32.partialorder %v135_v52, 0.0 }
  0xa7   :  { %259 = vtanh.f32 %v65_v35 }
  0xa8   :  { %261 = vtanh.f32 %v66_v22 }
  0xab   :  { %v256_v53 = vpop.eup %255 }
  0xac   :  { %v258_v54 = vpop.eup %257  ;;  %v137_v55 = vmul.f32 %v256_v53, %v134_v51 }
  0xad   :  { %v149_v56 = vmul.f32 %v258_v54, %v135_v52  ;;  %v260_v36 = vpop.eup %259 }
  0xae   :  { %v138_v57 = vmul.f32 %v256_v53, %v137_v55  ;;  %v262_v38 = vpop.eup %261  ;;  %v69_v40 = vmul.f32 0.5, %v260_v36 }
  0xaf   :  { %v150_v58 = vmul.f32 %v258_v54, %v149_v56  ;;  %v70_v41 = vmul.f32 0.5, %v262_v38 }
  0xb0   :  { %v139_v59 = vmul.f32 0.5, %v138_v57  ;;  %v71_v50 = vadd.f32 0.5, %v69_v40 }
  0xb1   :  { %v151_v60 = vmul.f32 0.5, %v150_v58 }
  0xb2   :  { %v140_v61 = vsub.f32 1.5, %v139_v59 }
  0xb3   :  { %v152_v62 = vsub.f32 1.5, %v151_v60 }
  0xb4   :  { %v141_v63 = vmul.f32 %v256_v53, %v140_v61 }
  0xb5   :  { %v153_v0 = vmul.f32 %v258_v54, %v152_v62 }
  0xb6   :  { %v142_v1 = vmul.f32 %v141_v63, %v134_v51 }
  0xb7   :  { %v154_v3 = vmul.f32 %v153_v0, %v135_v52 }
  0xb8   :  { %v144_v4 = vsel %vm143_vm9, %v134_v51, %v142_v1 }
  0xb9   :  { %v147_v6 = vsel %vm145_vm10, %v146_v2, %v144_v4  ;;  %v156_v7 = vsel %vm155_vm11, %v135_v52, %v154_v3  ;;  %v72_v52 = vadd.f32 0.5, %v70_v41 }
  0xba   :  { %v160_v8 = vmax.f32 %v147_v6, 1e-07  ;;  %v159_v9 = vsel %vm157_vm12, %v158_v5, %v156_v7 }
  0xbb   :  { %v161_v10 = vmax.f32 %v159_v9, 1e-07 }
  0xbc   :  { %v162_v12 = vmin.f32 %v160_v8, 0.9999999 }
  0xbd   :  { %v163_v13 = vmin.f32 %v161_v10, 0.9999999 }
  0xbe   :  { %172 = vrot.lane.b32.xlu1 %v162_v12, %s343_s0  ;;  %164 = vrot.lane.b32.xlu2 %v162_v12, %s344_s1 }
  0xbf   :  { %166 = vrot.lane.b32.xlu0 %v163_v13, %s344_s1 }
  0xc6   :  { %174 = vrot.lane.b32.xlu2 %v163_v13, %s343_s0 }
 0x118   :  { %v165_v14 = vpop.permute.xlu2 %164 }
 0x120   :  { %v175_v16 = vpop.permute.xlu2 %174 }
 0x130   :  { %v173_v17 = vpop.permute.xlu1 %172 }
 0x131   :  { %v176_v18 = vsel %vm90_vm0, %v173_v17, %v175_v16  ;;  %v177_v19 = vsel %vm90_vm0, %v175_v16, %v173_v17  ;;  %v167_v21 = vpop.permute.xlu0 %166 }
 0x132   :  { %v178_v23 = vsel %vm387_vm3, 0.0, %v176_v18  ;;  %v179_v24 = vsel %vm399_vm5, 0.0, %v177_v19  ;;  %v168_v26 = vsel %vm77_vm1, %v165_v14, %v167_v21  ;;  %v169_v28 = vsel %vm77_vm1, %v167_v21, %v165_v14 }
 0x133   :  { %v170_v29 = vsel %vm393_vm4, 0.0, %v169_v28  ;;  %v171_v30 = vsel %vm405_vm6, 0.0, %v168_v26 }
 0x134   :  { %v180_v31 = vmax.f32 %v170_v29, %v178_v23  ;;  %v181_v32 = vmax.f32 %v171_v30, %v179_v24 }
 0x136   :  { %v183_v33 = vmax.f32 %v163_v13, %v181_v32  ;;  %v182_v20 = vmax.f32 %v162_v12, %v180_v31 }
 0x138   :  { %186 = vrot.lane.b32.xlu1 %v183_v33, %s345_s19  ;;  %192 = vrot.lane.b32.xlu2 %v182_v20, %s346_s20 }
 0x139   :  { %184 = vrot.lane.b32.xlu0 %v182_v20, %s345_s19 }
 0x141   :  { %194 = vrot.lane.b32.xlu0 %v183_v33, %s346_s20 }
 0x192   :  { %v193_v42 = vpop.permute.xlu2 %192 }
 0x1aa   :  { %v187_v37 = vpop.permute.xlu1 %186 }
 0x1ab   :  { %v185_v27 = vpop.permute.xlu0 %184 }
 0x1ac   :  { %v189_v39 = vsel %vm49_vm2, %v187_v37, %v185_v27  ;;  %v188_v47 = vsel %vm49_vm2, %v185_v27, %v187_v37 }
 0x1ad   :  { %v190_v44 = vsel %vm49_vm2, 0.0, %v189_v39 }
 0x1b3   :  { %v195_v43 = vpop.permute.xlu0 %194 }
 0x1b4   :  { %v196_v45 = vsel %vm117_vm7, %v193_v42, %v195_v43  ;;  %v197_v46 = vsel %vm117_vm7, %v195_v43, %v193_v42 }
 0x1b5   :  { %v199_v48 = vsel %vm52_vm8, 0.0, %v197_v46  ;;  %v200_v49 = vmax.f32 %v190_v44, %v196_v45 }
 0x1b6   :  { %v201_v51 = vmax.f32 %v188_v47, %v199_v48 }
 0x1b7   :  { %v202_v53 = vmax.f32 %v182_v20, %v200_v49 }
 0x1b8   :  { %v203_v54 = vmax.f32 %v183_v33, %v201_v51 }
 0x1b9   :  { %v204_v55 = vsub.f32 %v202_v53, %v71_v50 }
 0x1ba   :  { %v205_v56 = vsub.f32 %v203_v54, %v72_v52 }
 0x1bb   :  { %v206_v57 = vmul.f32 %v204_v55, %v204_v55 }
 0x1bc   :  { %v207_v58 = vmul.f32 %v205_v56, %v205_v56 }
 0x1be   :  { %v208_v59 = vadd.f32 %v207_v58, %v206_v57 }
 0x1c0   :  { %209 = vadd.xlane.f32.xlu1 %v208_v59 }
 0x233   :  { %v210_v60 = vpop.xlane.xlu1 %209 }
 0x234   :  { %v212_v61 = vsel %vm211_vm13, %v210_v60, 0.0 }
 0x235   :  { %213 = vadd.xlane.f32.xlu2 %v212_v61 }
 0x2a8   :  { %v214_v11 = vpop.xlane.xlu2 %213 }
 0x2a9   :  { %v215_v62 = vrot.slane %v214_v11, 4 }
 0x2ab   :  { %v216_v15 = vadd.f32 %v215_v62, %v214_v11 }
 0x2ad   :  { %v217_v63 = vrot.slane %v216_v15, 2 }
 0x2af   :  { %v218_v0 = vadd.f32 %v217_v63, %v216_v15 }
 0x2b1   :  { %v219_v1 = vrot.slane %v218_v0, 1 }
 0x2b3   :  { %v220_v2 = vadd.f32 %v219_v1, %v218_v0 }
 0x2b5   :  { %242 = vpush %v220_v2 }
 0x2e6   :  { %s243_s26 = spop %242 }
 0x2e7   :  { %v222_v3 = vstv %s243_s26 }
 0x2e8   :  { %223 = vst [vmem:[#allocation7] sm:$0x1] %v222_v3 }
 0x2e9   :  { %234 = dma.vmem_to_hbm [thread:$0]  %s230_s22, 16, %s232_s25, [#allocation4]  }
 0x2ea   :  { %339 = dma.done.wait [#allocation4], 16  }
 0x2eb   :  { %340 = vsyncadd [#allocation4], 4294967280 }
 0x2ec   :  { %239 = vsyncpa [#allocation3], 1 }
 0x2ed   :  { %240 = vsyncpa [#allocation6], 1 }
 0x2ee   :  { %241 = vsyncpa [#allocation4], 1 }

</bundles_post_ra>
